<compile_context>
chip_gen: v6e
topology: v6e:2x2x1
jax: 0.10.0
libtpu: 0.0.40
codegen_flags: <defaults>
</compile_context>

<pallas_src>
import math

import jax
import jax.numpy as jnp
from jax import lax
from jax.experimental import pallas as pl
from jax.experimental.pallas import tpu as pltpu

LANES = 128
MAX_BLOCK_ROWS = 8192                       # (8192, 128) f32 = 4 MiB per stream block
VMEM_LIMIT_BYTES = 40 * 1024 * 1024         # 3 streams x 2 bufs x 4 MiB + headroom (< v7x 64 MiB)
HALF_LOG_2PI = 0.5 * math.log(2.0 * math.pi)


def _cdiv(a, b):
    return (a + b - 1) // b


# ------------------------------- kernel ------------------------------------ #
def _make_nll_kernel(block_rows, tail_valid, needs_mask):
    """Gaussian log-prob streaming reduction (closure over static sizes)."""

    def kernel(mu_ref, std_ref, y_ref, out_ref):
        r = pl.program_id(0)                    # row-block (streaming) axis, OUTER
        z = pl.program_id(1)                    # z-sample axis, INNER
        last_r = pl.num_programs(0) - 1

        mu = mu_ref[0].astype(jnp.float32)      # (block_rows, 128)
        std = std_ref[0].astype(jnp.float32)
        y = y_ref[...].astype(jnp.float32)

        zn = (y - mu) / std
        logp = -0.5 * (zn * zn) - jnp.log(std) - HALF_LOG_2PI

        if needs_mask:
            # Lane padding / OOB garbage only lives in the last row block.
            row_i = lax.broadcasted_iota(jnp.int32, (block_rows, LANES), 0)
            col_i = lax.broadcasted_iota(jnp.int32, (block_rows, LANES), 1)
            idx = row_i * LANES + col_i
            keep = jnp.logical_or(r < last_r, idx < tail_valid)
            logp = jnp.where(keep, logp, 0.0)

        # Cross-sublane reduce each step -> tiny lane-partial accumulator.
        partial = jnp.sum(logp, axis=0, keepdims=True)          # (1, 128)

        @pl.when(r == 0)
        def _init():
            out_ref[z] = partial

        @pl.when(r > 0)
        def _acc():
            out_ref[z] += partial

    return kernel


# ------------------------------- wrapper ------------------------------------ #
def social_process_loss_categorical(pred_mu, pred_std, target_future,
                                    q_target_mu, q_target_std,
                                    q_context_mu, q_context_std,
                                    *, max_block_rows=MAX_BLOCK_ROWS):
    """Equivalent of SocialProcessLossCategorical.forward -> (loss, nll, kl, 0)."""
    nz = pred_mu.shape[0]
    n_elem = int(math.prod(pred_mu.shape[1:]))          # elements per z-sample
    rows = _cdiv(n_elem, LANES)
    lane_pad = rows * LANES - n_elem                    # pad only to next 128 multiple

    if rows <= max_block_rows:
        block_rows = rows                               # full-extent block (legal)
        num_row_blocks = 1
    else:
        block_rows = max_block_rows                     # multiple of 8
        num_row_blocks = _cdiv(rows, block_rows)        # ragged last block allowed

    tail_valid = n_elem - (num_row_blocks - 1) * block_rows * LANES
    needs_mask = (num_row_blocks * block_rows * LANES) != n_elem

    def prep_pred(x, pad_val):
        x = x.reshape(nz, n_elem)                       # native dtype, no upcast
        if lane_pad:
            x = jnp.pad(x, ((0, 0), (0, lane_pad)), constant_values=pad_val)
        return x.reshape(nz, rows, LANES)

    def prep_target(x):
        x = x.reshape(n_elem)
        if lane_pad:
            x = jnp.pad(x, (0, lane_pad))
        return x.reshape(rows, LANES)

    mu3 = prep_pred(pred_mu, 0.0)
    std3 = prep_pred(pred_std, 1.0)                     # benign pad (masked anyway)
    y2 = prep_target(target_future)                     # streamed once, reused across z

    kernel = _make_nll_kernel(block_rows, tail_valid, needs_mask)

    lane_partials = pl.pallas_call(
        kernel,
        out_shape=jax.ShapeDtypeStruct((nz, 1, LANES), jnp.float32),
        grid_spec=pltpu.PrefetchScalarGridSpec(
            num_scalar_prefetch=0,
            grid=(num_row_blocks, nz),                  # row blocks OUTER, z INNER
            in_specs=[
                pl.BlockSpec((1, block_rows, LANES), lambda r, z: (z, r, 0)),  # mu
                pl.BlockSpec((1, block_rows, LANES), lambda r, z: (z, r, 0)),  # std
                pl.BlockSpec((block_rows, LANES),    lambda r, z: (r, 0)),     # target (fetched once per r)
            ],
            out_specs=pl.BlockSpec((nz, 1, LANES), lambda r, z: (0, 0, 0)),    # resident accumulator
        ),
        compiler_params=pltpu.CompilerParams(
            dimension_semantics=("arbitrary", "arbitrary"),
            vmem_limit_bytes=VMEM_LIMIT_BYTES),
    )(mu3, std3, y2)

    logp_sum = jnp.sum(lane_partials)                   # sum over z-samples and lanes
    nll = -logp_sum / nz                                # (-log_prob).mean(0).sum()

    # KL of diagonal Gaussians, computed once on the tiny (batch, z_dim) operands.
    qtm = q_target_mu.astype(jnp.float32)
    qts = q_target_std.astype(jnp.float32)
    qcm = q_context_mu.astype(jnp.float32)
    qcs = q_context_std.astype(jnp.float32)
    kl_elem = (jnp.log(qcs) - jnp.log(qts)
               + (qts * qts + (qtm - qcm) ** 2) / (2.0 * qcs * qcs) - 0.5)
    kl = kl_elem.mean(axis=0).sum()                     # .mean(dim=0).sum()

    loss = nll + kl
    aux = jnp.array(0, dtype=jnp.int32)                 # torch.tensor(0)
    return loss, nll, kl, aux


# --------------------------- pure-JAX reference ----------------------------- #
def _reference(pred_mu, pred_std, target_future,
               q_target_mu, q_target_std, q_context_mu, q_context_std):
    pm = pred_mu.astype(jnp.float32)
    ps = pred_std.astype(jnp.float32)
    y = target_future.astype(jnp.float32)
    logp = (-((y[None] - pm) ** 2) / (2.0 * ps ** 2)
            - jnp.log(ps) - 0.5 * jnp.log(2.0 * jnp.pi))
    nll = -(logp.mean(axis=0).sum())
    qtm = q_target_mu.astype(jnp.float32)
    qts = q_target_std.astype(jnp.float32)
    qcm = q_context_mu.astype(jnp.float32)
    qcs = q_context_std.astype(jnp.float32)
    kl = (jnp.log(qcs) - jnp.log(qts)
          + (qts ** 2 + (qtm - qcm) ** 2) / (2.0 * qcs ** 2) - 0.5)
    kl = kl.mean(axis=0).sum()
    return nll + kl, nll, kl


# ------------------------------- driver ------------------------------------ #
if __name__ == "__main__":
    def run_case(nz, seq, batch, npeople, data_dim, z_dim,
                 dtype=jnp.float32, max_block_rows=MAX_BLOCK_ROWS, seed=0):
        key = jax.random.PRNGKey(seed)
        k = jax.random.split(key, 7)
        pred_mu = jax.random.normal(k[0], (nz, seq, batch, npeople, data_dim),
                                    jnp.float32).astype(dtype)
        pred_std = (0.1 + jax.nn.softplus(
            jax.random.normal(k[1], (nz, seq, batch, npeople, data_dim),
                              jnp.float32))).astype(dtype)
        target_future = jax.random.normal(k[2], (seq, batch, npeople, data_dim),
                                          jnp.float32).astype(dtype)
        q_target_mu = jax.random.normal(k[3], (batch, z_dim), jnp.float32)
        q_target_std = 0.1 + jax.nn.softplus(
            jax.random.normal(k[4], (batch, z_dim), jnp.float32))
        q_context_mu = jax.random.normal(k[5], (batch, z_dim), jnp.float32)
        q_context_std = 0.1 + jax.nn.softplus(
            jax.random.normal(k[6], (batch, z_dim), jnp.float32))

        loss_fn = jax.jit(lambda *a: social_process_loss_categorical(
            *a, max_block_rows=max_block_rows))
        loss, nll, kl, aux = loss_fn(pred_mu, pred_std, target_future,
                                     q_target_mu, q_target_std,
                                     q_context_mu, q_context_std)
        jax.block_until_ready((loss, nll, kl, aux))

        ref_loss, ref_nll, ref_kl = _reference(pred_mu, pred_std, target_future,
                                               q_target_mu, q_target_std,
                                               q_context_mu, q_context_std)
        assert jnp.allclose(loss, ref_loss, rtol=1e-4, atol=1e-4), (loss, ref_loss)
        assert jnp.allclose(nll, ref_nll, rtol=1e-4, atol=1e-4), (nll, ref_nll)
        assert jnp.allclose(kl, ref_kl, rtol=1e-4, atol=1e-4), (kl, ref_kl)
        assert int(aux) == 0

    # lane-aligned case (no padding, single row block per z-sample)
    run_case(nz=4, seq=8, batch=2, npeople=2, data_dim=8, z_dim=32)
    # ragged case (exercises lane padding + in-kernel tail masking)
    run_case(nz=3, seq=5, batch=2, npeople=3, data_dim=6, z_dim=32)
    # multi-row-block case (exercises grid reorder / target reuse / ragged OOB tail)
    run_case(nz=3, seq=16, batch=2, npeople=3, data_dim=12, z_dim=32,
             max_block_rows=8)
    # bf16 inputs (exercises native-dtype streaming + in-kernel upcast)
    run_case(nz=2, seq=8, batch=2, npeople=2, data_dim=8, z_dim=32,
             dtype=jnp.bfloat16)

    print("KERNEL_OK")
</pallas_src>

<mosaic_0001>
module attributes {stable_mosaic.version = 11 : i64} {
  func.func @kernel(%arg0: i32, %arg1: i32, %arg2: memref<1x2x128xf32, #tpu.memory_space<vmem>>, %arg3: memref<1x2x128xf32, #tpu.memory_space<vmem>>, %arg4: memref<2x128xf32, #tpu.memory_space<vmem>>, %arg5: memref<4x1x128xf32, #tpu.memory_space<vmem>>) attributes {dimension_semantics = [#tpu.dimension_semantics<arbitrary>, #tpu.dimension_semantics<arbitrary>], iteration_bounds = array<i64: 1, 4>, scalar_prefetch = 0 : i64, scratch_operands = 0 : i64, tpu.core_type = #tpu.core_type<tc>, window_params = [{transform_indices = @transform_0, window_bounds = array<i64: 1, 2, 128>}, {transform_indices = @transform_1, window_bounds = array<i64: 1, 2, 128>}, {transform_indices = @transform_2, window_bounds = array<i64: 2, 128>}, {pipeline_mode = #tpu.pipeline_mode<synchronous>, transform_indices = @transform_3, window_bounds = array<i64: 4, 1, 128>}]} {
    %c0 = arith.constant 0 : index
    %c0_0 = arith.constant 0 : index
    %c0_1 = arith.constant 0 : index
    %0 = vector.load %arg2[%c0, %c0_0, %c0_1] : memref<1x2x128xf32, #tpu.memory_space<vmem>>, vector<1x2x128xf32>
    %1 = vector.shape_cast %0 : vector<1x2x128xf32> to vector<2x128xf32>
    %c0_2 = arith.constant 0 : index
    %c0_3 = arith.constant 0 : index
    %c0_4 = arith.constant 0 : index
    %2 = vector.load %arg3[%c0_2, %c0_3, %c0_4] : memref<1x2x128xf32, #tpu.memory_space<vmem>>, vector<1x2x128xf32>
    %3 = vector.shape_cast %2 : vector<1x2x128xf32> to vector<2x128xf32>
    %c0_5 = arith.constant 0 : index
    %c0_6 = arith.constant 0 : index
    %4 = vector.load %arg4[%c0_5, %c0_6] : memref<2x128xf32, #tpu.memory_space<vmem>>, vector<2x128xf32>
    %5 = arith.subf %4, %1 : vector<2x128xf32>
    %6 = arith.divf %5, %3 : vector<2x128xf32>
    %7 = arith.mulf %6, %6 : vector<2x128xf32>
    %cst = arith.constant -5.000000e-01 : f32
    %8 = vector.broadcast %cst : f32 to vector<2x128xf32>
    %9 = arith.mulf %8, %7 : vector<2x128xf32>
    %10 = math.log %3 : vector<2x128xf32>
    %11 = arith.subf %9, %10 : vector<2x128xf32>
    %cst_7 = arith.constant 0.918938517 : f32
    %12 = vector.broadcast %cst_7 : f32 to vector<2x128xf32>
    %13 = arith.subf %11, %12 : vector<2x128xf32>
    %cst_8 = arith.constant dense<0.000000e+00> : vector<128xf32>
    %14 = vector.multi_reduction <add>, %13, %cst_8 [0] : vector<2x128xf32> to vector<128xf32>
    %15 = vector.shape_cast %14 : vector<128xf32> to vector<1x128xf32>
    %c0_i32 = arith.constant 0 : i32
    %16 = arith.cmpi eq, %arg0, %c0_i32 : i32
    %17 = arith.extui %16 : i1 to i32
    %c0_i32_9 = arith.constant 0 : i32
    %18 = arith.cmpi ne, %17, %c0_i32_9 : i32
    scf.if %18 {
      %22 = arith.index_cast %arg1 : i32 to index
      %c0_12 = arith.constant 0 : index
      %c0_13 = arith.constant 0 : index
      %23 = vector.load %arg5[%22, %c0_12, %c0_13] : memref<4x1x128xf32, #tpu.memory_space<vmem>>, vector<1x1x128xf32>
      %24 = vector.shape_cast %23 : vector<1x1x128xf32> to vector<1x128xf32>
      %25 = vector.shape_cast %15 : vector<1x128xf32> to vector<1x1x128xf32>
      tpu.vector_store %arg5[%22, %c0_12, %c0_13], %25 {strides = array<i32>} : memref<4x1x128xf32, #tpu.memory_space<vmem>>, vector<1x1x128xf32>,
    } else {
    }
    %c0_i32_10 = arith.constant 0 : i32
    %19 = arith.cmpi sgt, %arg0, %c0_i32_10 : i32
    %20 = arith.extui %19 : i1 to i32
    %c0_i32_11 = arith.constant 0 : i32
    %21 = arith.cmpi ne, %20, %c0_i32_11 : i32
    scf.if %21 {
      %22 = arith.index_cast %arg1 : i32 to index
      %c0_12 = arith.constant 0 : index
      %c0_13 = arith.constant 0 : index
      %23 = vector.load %arg5[%22, %c0_12, %c0_13] : memref<4x1x128xf32, #tpu.memory_space<vmem>>, vector<1x1x128xf32>
      %24 = vector.shape_cast %23 : vector<1x1x128xf32> to vector<1x128xf32>
      %25 = arith.addf %24, %15 : vector<1x128xf32>
      %26 = arith.index_cast %arg1 : i32 to index
      %c0_14 = arith.constant 0 : index
      %c0_15 = arith.constant 0 : index
      %27 = vector.load %arg5[%26, %c0_14, %c0_15] : memref<4x1x128xf32, #tpu.memory_space<vmem>>, vector<1x1x128xf32>
      %28 = vector.shape_cast %27 : vector<1x1x128xf32> to vector<1x128xf32>
      %29 = vector.shape_cast %25 : vector<1x128xf32> to vector<1x1x128xf32>
      tpu.vector_store %arg5[%26, %c0_14, %c0_15], %29 {strides = array<i32>} : memref<4x1x128xf32, #tpu.memory_space<vmem>>, vector<1x1x128xf32>,
    } else {
    }
    return
  }
  func.func @transform_0(%arg0: i32, %arg1: i32) -> (i32, i32, i32) {
    %c0_i32 = arith.constant 0 : i32
    %c0_i32_0 = arith.constant 0 : i32
    return %arg1, %arg0, %c0_i32 : i32, i32, i32
  }
  func.func @transform_1(%arg0: i32, %arg1: i32) -> (i32, i32, i32) {
    %c0_i32 = arith.constant 0 : i32
    %c0_i32_0 = arith.constant 0 : i32
    return %arg1, %arg0, %c0_i32 : i32, i32, i32
  }
  func.func @transform_2(%arg0: i32, %arg1: i32) -> (i32, i32) {
    %c0_i32 = arith.constant 0 : i32
    %c0_i32_0 = arith.constant 0 : i32
    return %arg0, %c0_i32 : i32, i32
  }
  func.func @transform_3(%arg0: i32, %arg1: i32) -> (i32, i32, i32) {
    %c0_i32 = arith.constant 0 : i32
    %c0_i32_0 = arith.constant 0 : i32
    %c0_i32_1 = arith.constant 0 : i32
    %c0_i32_2 = arith.constant 0 : i32
    return %c0_i32, %c0_i32_0, %c0_i32_1 : i32, i32, i32
  }
}

</mosaic_0001>

<bundles_post_ra>
// kernel: _lambda_.1
= control target key start
LH: loop header
LB: loop body
LE: loop exit
PB: predicated region body
PF: predicated region fallthrough
CT: control target
= control target key end

     0   :  { %s409_s12 = smov 0   ;;  %s411_s13 = smov 0   ;;  %s453_s0 = inlined_call_operand.vmem [shape: f32[4,2,128], index: 0, kind: input, shape index: {}]   ;;  %s454_s1 = inlined_call_operand.vmem [shape: f32[4,2,128], index: 1, kind: input, shape index: {}]   ;;  %s455_s2 = inlined_call_operand.vmem [shape: f32[2,128], index: 2, kind: input, shape index: {}]   ;;  %s456_s3 = inlined_call_operand.vmem [shape: f32[4,1,128], index: 3, kind: output, shape index: {}]  }
   0x1   :  { %s413_s14 = smov 0  }
   0x2 LB: > { %s22_s15 = sadd.s32 1, %s383_s13  ;;  %p331_p0 = scmp.ge.s32.totalorder %s387_s14, 1  ;;  %s387_s14 = sphi %s413_s14, %s13_s14   ;;  %s383_s13 = sphi %s411_s13, %s458_s13   ;;  %s379_s12 = sphi %s409_s12, %s457_s12  }
   0x3   : > { %p23_p1 = scmp.ge.s32.totalorder %s22_s15, 4  ;;  %p171_p2 = scmp.lt.s32.totalorder %s387_s14, 5 }
   0x5   : > { %s460_s15 = smov (%p23_p1, %s22_s15), 0  ;;  %p172_p3 = pnand %p331_p0, %p171_p2 }
   0x6   : > { %p203_p4 = scmp.lt.s32.totalorder (!%p172_p3), %s379_s12, 3  ;;  %s245_s28 = scalar_lea.vmem (!%p172_p3), %s456_s3, %s379_s12 }
   0x7   : > { %175 = sbr.rel (%p172_p3) target bundleno = 55 (0x37), region = 32 }
   0xc   : > { %s204_s16 = scalar_select %p203_p4, %s379_s12, 3  ;;  %v223_v2 = vld [vmem:[%s455_s2] sm:$0x3]  ;;  %vm233_vm0 = vcmask 1041408  }
   0xe   : > { %s332_s17 = sshll.u32 %s204_s16, 1 }
   0xf   : > { %s216_s20 = scalar_lea.vmem %s454_s1, %s332_s17  ;;  %s209_s23 = scalar_lea.vmem %s453_s0, %s332_s17 }
  0x10   : > { %v222_v0 = vld [vmem:[%s216_s20] sm:$0x3] }
  0x11   : > { %361 = vrcp.f32 %v222_v0  ;;  %v221_v1 = vld [vmem:[%s209_s23] sm:$0x3] }
  0x12   : > { %363 = vlog2.f32 %v222_v0  ;;  %v224_v3 = vsub.f32 %v223_v2, %v221_v1 }
  0x1e   : > { %v362_v4 = vpop.eup %361 }
  0x1f   : > { %v364_v5 = vpop.eup %363  ;;  %v226_v6 = vmul.f32 %v362_v4, %v224_v3 }
  0x20   : > { %v230_v8 = vmul.f32 0.6931472, %v364_v5 }
  0x21   : > { %v227_v7 = vmul.f32 %v226_v6, %v226_v6 }
  0x23   : > { %v228_v9 = vmul.f32 -0.5, %v227_v7 }
  0x25   : > { %v231_v10 = vsub.f32 %v228_v9, %v230_v8 }
  0x27   : > { %v334_v11 = vadd.f32 -0.9189385, %v231_v10 }
  0x29   : > { %v234_v12 = vsel %vm233_vm0, %v334_v11, 0.0 }
  0x2a   : > { %v235_v13 = vrot.slane %v234_v12, 4 }
  0x2c   : > { %v236_v14 = vadd.f32 %v235_v13, %v234_v12 }
  0x2e   : > { %v237_v15 = vrot.slane %v236_v14, 2 }
  0x30   : > { %v238_v16 = vadd.f32 %v237_v15, %v236_v14 }
  0x32   : > { %v239_v17 = vrot.slane %v238_v16, 1 }
  0x34   : > { %v240_v18 = vadd.f32 %v239_v17, %v238_v16 }
  0x36   : > { %246 = vst [vmem:[%s245_s28] sm:$0x1] %v240_v18 }
  0x37 PF: > { %s13_s14 = sadd.s32 1, %s387_s14   ;;  %s457_s12 = smov %s383_s13 }
  0x38   : > { %p10_p5 = scmp.ge.s32.totalorder %s13_s14, 6   ;;  %s458_s13 = smov %s460_s15 }
  0x3a   :  { %12 = sbr.rel (!%p10_p5) target bundleno = 2 (0x2), region = 74 }

</bundles_post_ra>
